<compile_context>
chip_gen: v7x
topology: tpu7x:2x2x1
jax: 0.10.0
libtpu: 0.0.40
codegen_flags: <defaults>
</compile_context>

<pallas_src>
import math

import jax
import jax.numpy as jnp
import numpy as np
from jax.experimental import pallas as pl
from jax.experimental.pallas import tpu as pltpu


def _ru(x, m):
    """Round x up to a multiple of m."""
    return ((x + m - 1) // m) * m


def _tpu_caps():
    """Best-effort (VMEM bytes, TensorCores per chip). Conservative fallback."""
    vmem = 64 << 20     # v7x-safe default; v5e/v6e actually have 128 MiB
    cores = 1
    try:
        get_info = getattr(pltpu, "get_tpu_info", None)
        if get_info is not None:
            info = get_info()
            v = getattr(info, "vmem_capacity_bytes", None)
            if isinstance(v, int) and v > 0:
                vmem = v
            for name in ("num_tensorcores", "tensorcores_per_chip",
                         "num_cores", "cores_per_chip"):
                c = getattr(info, name, None)
                if isinstance(c, int) and c > 0:
                    cores = min(int(c), 2)
                    break
    except Exception:
        pass
    return vmem, cores


def _make_pooler_kernel(single_t_step):
    def kernel(seq_ref, madd_ref, w_ref, b_ref, out_ref, acc_ref):
        # seq_ref : (Bt, tT, d_inp)   bf16
        # madd_ref: (Bt, tT)          bf16 additive mask (0 valid / -inf pad)
        # w_ref   : (d_inp, Nt)       bf16
        # b_ref   : (1, Nt)           f32
        # out_ref : (Bt, Nt)          f32
        # acc_ref : (Bt, Nt)          f32 running max (VMEM scratch)
        bt, tt, d_inp = seq_ref.shape
        x = seq_ref[...].reshape(bt * tt, d_inp)     # free re-view (tT % 8 == 0)
        proj = jnp.dot(x, w_ref[...], preferred_element_type=jnp.float32)
        proj = proj.reshape(bt, tt, -1)              # (Bt, tT, Nt)
        # additive mask: one VPU add per element instead of cmp+select.
        proj = proj + madd_ref[...].astype(jnp.float32)[:, :, None]
        blk_max = jnp.max(proj, axis=1)              # (Bt, Nt)

        if single_t_step:
            # whole T in one tile: skip the accumulator round-trip entirely.
            out_ref[...] = (blk_max + b_ref[...]).astype(out_ref.dtype)
        else:
            t = pl.program_id(2)

            @pl.when(t == 0)
            def _init():
                acc_ref[...] = jnp.full(acc_ref.shape, -jnp.inf,
                                        dtype=acc_ref.dtype)

            acc_ref[...] = jnp.maximum(acc_ref[...], blk_max)

            @pl.when(t == pl.num_programs(2) - 1)
            def _finalize():
                out_ref[...] = (acc_ref[...] + b_ref[...]).astype(out_ref.dtype)

    return kernel


def pooler_max(sequence, mask, weight, bias, *,
               block_b=None, block_t=None, block_n=None):
    """Pooler forward (project=True, pool_type='max').

    sequence: (B, T, d_inp) float
    mask    : (B, T) or (B, T, 1), 1 for valid / 0 for pad, or None
    weight  : (d_inp, d_proj)  (already transposed vs. torch Linear.weight)
    bias    : (d_proj,)
    returns : (B, d_proj) float32

    Note: rows whose mask is all zero (and any internal padding rows before
    slicing) produce -inf, matching the PyTorch masked_fill + max semantics.
    Inputs are computed in bf16 with f32 accumulation (accuracy trade-off).
    """
    B, T, d_inp = sequence.shape
    d_proj = weight.shape[1]

    if mask is None:
        mask = jnp.ones((B, T), dtype=jnp.float32)
    if mask.ndim == 3:
        mask = mask[..., 0]

    vmem_cap, cores = _tpu_caps()
    usable = max(vmem_cap - (16 << 20), 24 << 20)   # leave compiler headroom

    # --- time tile: always 8-aligned; 128-aligned when T is actually tiled --
    T8 = _ru(T, 8)
    if block_t is None:
        block_t = min(T8, 512)
    if block_t >= T8:
        block_t = T8                                   # single T tile
    else:
        block_t = min(T8, max(128, _ru(block_t, 128)))
        if block_t >= T8:
            block_t = T8

    # --- batch tile: multiple of 8; target flattened matmul M ~ 1024 rows ---
    if block_b is None:
        bb = max(8, _ru(max(1, 1024 // block_t), 8))
        block_b = min(bb, _ru(B, 8))
        if cores > 1:
            # keep >=1 batch block per TensorCore (v7x megacore)
            block_b = min(block_b, max(8, _ru(-(-B // cores), 8)))
    block_b = max(8, _ru(block_b, 8))

    grid_b = -(-B // block_b)
    if cores > 1 and grid_b < cores:
        grid_b = cores          # pad B so every TensorCore gets a block
    Bp = grid_b * block_b

    # --- projection-column tile: N-tile d_proj if VMEM budget demands it ----
    def est_vmem(bt, bn):
        return (2 * block_b * bt * d_inp * 2        # seq tiles (bf16, 2-buffered)
                + 2 * block_b * bt * 2              # additive mask (bf16)
                + 2 * d_inp * bn * 2                # weight (bf16, 2-buffered)
                + 2 * bn * 4                        # bias
                + 2 * block_b * bn * 4              # output
                + block_b * bn * 4                  # running-max scratch
                + block_b * bt * bn * 4)            # f32 matmul intermediate

    if block_n is None:
        block_n = d_proj
        if est_vmem(block_t, block_n) > usable and d_proj > 128:
            block_n = _ru(d_proj, 128)
            while est_vmem(block_t, block_n) > usable and block_n > 128:
                block_n = max(128, _ru(block_n // 2, 128))
    # last resort: shrink the time tile (stays 128-aligned)
    while est_vmem(block_t, block_n) > usable and block_t > 128:
        block_t = max(128, _ru(block_t // 2, 128))

    grid_t = -(-T // block_t)
    grid_n = -(-d_proj // block_n)
    Tp = grid_t * block_t
    Np = grid_n * block_n

    # --- prepare / pad inputs ----------------------------------------------
    seq = sequence.astype(jnp.bfloat16)
    w = weight.astype(jnp.bfloat16)
    bias2d = bias.astype(jnp.float32).reshape(1, d_proj)
    # additive mask: 0 where valid, -inf where padded.
    madd = jnp.where(mask == 0, -jnp.inf, 0.0).astype(jnp.float32)

    if (Bp, Tp) != (B, T):
        seq = jnp.pad(seq, ((0, Bp - B), (0, Tp - T), (0, 0)))
        madd = jnp.pad(madd, ((0, Bp - B), (0, Tp - T)),
                       constant_values=-jnp.inf)       # pads never win the max
    if Np != d_proj:
        w = jnp.pad(w, ((0, 0), (0, Np - d_proj)))
        bias2d = jnp.pad(bias2d, ((0, 0), (0, Np - d_proj)))
    madd = madd.astype(jnp.bfloat16)                    # halve mask traffic

    est = est_vmem(block_t, block_n)
    vmem_limit = int(min(max(est + (4 << 20), 16 << 20), usable))

    kernel = _make_pooler_kernel(single_t_step=(grid_t == 1))

    out = pl.pallas_call(
        kernel,
        out_shape=jax.ShapeDtypeStruct((Bp, Np), jnp.float32),
        grid_spec=pltpu.PrefetchScalarGridSpec(
            num_scalar_prefetch=0,
            grid=(grid_b, grid_n, grid_t),
            in_specs=[
                pl.BlockSpec((block_b, block_t, d_inp),
                             lambda bi, ni, ti: (bi, ti, 0)),
                pl.BlockSpec((block_b, block_t),
                             lambda bi, ni, ti: (bi, ti)),
                pl.BlockSpec((d_inp, block_n),
                             lambda bi, ni, ti: (0, ni)),
                pl.BlockSpec((1, block_n),
                             lambda bi, ni, ti: (0, ni)),
            ],
            out_specs=pl.BlockSpec((block_b, block_n),
                                   lambda bi, ni, ti: (bi, ni)),
            scratch_shapes=[pltpu.VMEM((block_b, block_n), jnp.float32)],
        ),
        compiler_params=pltpu.CompilerParams(
            dimension_semantics=("parallel", "parallel", "arbitrary"),
            vmem_limit_bytes=vmem_limit,
        ),
    )(seq, madd, w, bias2d)
    return out[:B, :d_proj]


def pooler_max_ref(sequence, mask, weight, bias):
    """Pure-JAX reference reproducing the PyTorch forward (pool_type='max')."""
    if mask.ndim < 3:
        mask = mask[..., None]
    proj = jnp.einsum("btd,de->bte", sequence, weight) + bias
    proj = jnp.where(mask == 0, -jnp.inf, proj)
    return jnp.max(proj, axis=1)


if __name__ == "__main__":
    def run_case(key, B, T, d_inp, d_proj, lengths, **kw):
        k_seq, k_w, k_b = jax.random.split(key, 3)
        sequence = jax.random.normal(k_seq, (B, T, d_inp), dtype=jnp.float32)
        bound = 1.0 / math.sqrt(d_inp)
        weight = jax.random.uniform(k_w, (d_inp, d_proj), jnp.float32, -bound, bound)
        bias = jax.random.uniform(k_b, (d_proj,), jnp.float32, -bound, bound)
        mask = (jnp.arange(T)[None, :] < lengths[:, None]).astype(jnp.float32)

        out = jax.block_until_ready(pooler_max(sequence, mask, weight, bias, **kw))
        ref = pooler_max_ref(sequence, mask, weight, bias)
        # bf16 matmul inputs with f32 accumulation -> loose tolerance.
        np.testing.assert_allclose(np.asarray(out), np.asarray(ref),
                                   rtol=2e-2, atol=2e-2)

    key = jax.random.PRNGKey(0)
    k1, k2 = jax.random.split(key)

    # Case 1: small module-like shapes (bsz=8, T=16, d_inp=32, d_proj=32);
    # single T tile -> direct-write path, one (8*16, 32) x (32, 32) matmul.
    run_case(k1, 8, 16, 32, 32,
             jnp.array([16, 5, 16, 1, 9, 16, 12, 3], dtype=jnp.int32))

    # Case 2: exercises the T-reduction grid axis (T=250 padded to 256,
    # tiled at tT=128) and the running-max VMEM accumulator.
    run_case(k2, 6, 250, 32, 64,
             jnp.array([250, 17, 200, 1, 96, 133], dtype=jnp.int32),
             block_t=128)

    print("KERNEL_OK")
</pallas_src>

<mosaic_0001>
module attributes {stable_mosaic.version = 11 : i64} {
  func.func @kernel(%arg0: i32, %arg1: i32, %arg2: i32, %arg3: memref<8x16x32xbf16, #tpu.memory_space<vmem>>, %arg4: memref<8x16xbf16, #tpu.memory_space<vmem>>, %arg5: memref<32x32xbf16, #tpu.memory_space<vmem>>, %arg6: memref<1x32xf32, #tpu.memory_space<vmem>>, %arg7: memref<8x32xf32, #tpu.memory_space<vmem>>, %arg8: memref<8x32xf32, #tpu.memory_space<vmem>>) attributes {dimension_semantics = [#tpu.dimension_semantics<parallel>, #tpu.dimension_semantics<parallel>, #tpu.dimension_semantics<arbitrary>], iteration_bounds = array<i64: 1, 1, 1>, scalar_prefetch = 0 : i64, scratch_operands = 1 : i64, tpu.core_type = #tpu.core_type<tc>, window_params = [{transform_indices = @transform_0, window_bounds = array<i64: 8, 16, 32>}, {transform_indices = @transform_1, window_bounds = array<i64: 8, 16>}, {transform_indices = @transform_2, window_bounds = array<i64: 32, 32>}, {transform_indices = @transform_3, window_bounds = array<i64: 1, 32>}, {transform_indices = @transform_4, window_bounds = array<i64: 8, 32>}]} {
    %c0 = arith.constant 0 : index
    %c0_0 = arith.constant 0 : index
    %c0_1 = arith.constant 0 : index
    %0 = vector.load %arg3[%c0, %c0_0, %c0_1] : memref<8x16x32xbf16, #tpu.memory_space<vmem>>, vector<8x16x32xbf16>
    %1 = vector.shape_cast %0 : vector<8x16x32xbf16> to vector<128x32xbf16>
    %c0_2 = arith.constant 0 : index
    %c0_3 = arith.constant 0 : index
    %2 = vector.load %arg5[%c0_2, %c0_3] : memref<32x32xbf16, #tpu.memory_space<vmem>>, vector<32x32xbf16>
    %cst = arith.constant dense<0.000000e+00> : vector<128x32xf32>
    %3 = tpu.matmul %1, %2, %cst {dimension_numbers = #tpu.dot_dimension_numbers<[1], [0], [0], [1], [0, 0, 1, 1], [], []>} : vector<128x32xbf16>, vector<32x32xbf16>, vector<128x32xf32> -> vector<128x32xf32>
    %4 = vector.shape_cast %3 : vector<128x32xf32> to vector<8x16x32xf32>
    %c0_4 = arith.constant 0 : index
    %c0_5 = arith.constant 0 : index
    %5 = vector.load %arg4[%c0_4, %c0_5] : memref<8x16xbf16, #tpu.memory_space<vmem>>, vector<8x16xbf16>
    %6 = arith.extf %5 : vector<8x16xbf16> to vector<8x16xf32>
    %7 = vector.shape_cast %6 : vector<8x16xf32> to vector<8x16x1xf32>
    %8 = vector.broadcast %7 : vector<8x16x1xf32> to vector<8x16x32xf32>
    %9 = arith.addf %4, %8 : vector<8x16x32xf32>
    %cst_6 = arith.constant dense<0xFF800000> : vector<8x32xf32>
    %10 = vector.multi_reduction <maximumf>, %9, %cst_6 [1] : vector<8x16x32xf32> to vector<8x32xf32>
    %c0_7 = arith.constant 0 : index
    %c0_8 = arith.constant 0 : index
    %11 = vector.load %arg6[%c0_7, %c0_8] : memref<1x32xf32, #tpu.memory_space<vmem>>, vector<1x32xf32>
    %12 = vector.broadcast %11 : vector<1x32xf32> to vector<8x32xf32>
    %13 = arith.addf %10, %12 : vector<8x32xf32>
    %c0_9 = arith.constant 0 : index
    %c0_10 = arith.constant 0 : index
    %14 = vector.load %arg7[%c0_9, %c0_10] : memref<8x32xf32, #tpu.memory_space<vmem>>, vector<8x32xf32>
    tpu.vector_store %arg7[%c0_9, %c0_10], %13 {strides = array<i32>} : memref<8x32xf32, #tpu.memory_space<vmem>>, vector<8x32xf32>,
    return
  }
  func.func @transform_0(%arg0: i32, %arg1: i32, %arg2: i32) -> (i32, i32, i32) {
    %c0_i32 = arith.constant 0 : i32
    %c0_i32_0 = arith.constant 0 : i32
    return %arg0, %arg2, %c0_i32 : i32, i32, i32
  }
  func.func @transform_1(%arg0: i32, %arg1: i32, %arg2: i32) -> (i32, i32) {
    %c0_i32 = arith.constant 0 : i32
    return %arg0, %arg2 : i32, i32
  }
  func.func @transform_2(%arg0: i32, %arg1: i32, %arg2: i32) -> (i32, i32) {
    %c0_i32 = arith.constant 0 : i32
    %c0_i32_0 = arith.constant 0 : i32
    return %c0_i32, %arg1 : i32, i32
  }
  func.func @transform_3(%arg0: i32, %arg1: i32, %arg2: i32) -> (i32, i32) {
    %c0_i32 = arith.constant 0 : i32
    %c0_i32_0 = arith.constant 0 : i32
    return %c0_i32, %arg1 : i32, i32
  }
  func.func @transform_4(%arg0: i32, %arg1: i32, %arg2: i32) -> (i32, i32) {
    %c0_i32 = arith.constant 0 : i32
    return %arg0, %arg1 : i32, i32
  }
}

</mosaic_0001>

<bundles_post_ra>
// kernel: tpu_custom_call.1
= control target key start
LH: loop header
LB: loop body
LE: loop exit
PB: predicated region body
PF: predicated region fallthrough
CT: control target
= control target key end

     0   :  { %9 = vsyncpa [#allocation4], 0  ;;  %s775_s0 = inlined_call_operand.hbm [shape: bf16[8,16,32], index: 0, kind: input, shape index: {}]   ;;  %s776_s1 = inlined_call_operand.hbm [shape: bf16[8,16], index: 1, kind: input, shape index: {}]   ;;  %s777_s2 = inlined_call_operand.hbm [shape: bf16[32,32], index: 2, kind: input, shape index: {}]   ;;  %s778_s3 = inlined_call_operand.vmem [shape: f32[1,32], index: 3, kind: input, shape index: {}]   ;;  %s779_s4 = inlined_call_operand.hbm [shape: f32[8,32], index: 4, kind: output, shape index: {}]  }
   0x1   :  { %10 = vsyncpa [#allocation7], 0 }
   0x2   :  { %11 = vsyncpa [#allocation5], 0  ;;  %s655_s15 = smov [#allocation6]   ;;  %s656_s17 = smov [#allocation3]  }
   0x3   :  { %s30_s16 = sshll.u32 %s655_s15, 4  ;;  %s17_s18 = sshll.u32 %s656_s17, 4  ;;  %s31_s16 = int_to_ptr.vmem [resolvable:$true] %s30_s16  ;;  %s686_s18 = int_to_ptr.vmem [resolvable:$true] %s17_s18 }
   0x4   :  { %s561_s21 = scalar_lea.hbm %s776_s1, 64 }
   0x5   :  { %p562_p0 = scmp.ne.s32.totalorder %s776_s1, %s561_s21  ;;  %p565_p1 = scmp.lt.u32.totalorder %s561_s21, %s776_s1 }
   0x7   :  { %p567_p2 = pnand %p565_p1, %p562_p0 }
   0x9   :  { %570 = shalt.err (!%p567_p2)
}
   0xa   :  { %s571_s26 = scalar_lea.vmem %s31_s16, 64  ;;  %p576_p4 = scmp.lt.s32.totalorder %s31_s16, %s31_s16 }
   0xb   :  { %p572_p3 = scmp.ne.s32.totalorder %s31_s16, %s571_s26  ;;  %p577_p5 = scmp.lt.s32.totalorder %s571_s26, %s571_s26 }
   0xd   :  { %p578_p6 = por %p577_p5, %p576_p4 }
   0xf   :  { %p579_p7 = pnand %p578_p6, %p572_p3 }
  0x11   :  { %582 = shalt.err (!%p579_p7)
}
  0x12   :  { %33 = dma.hbm_to_vmem [thread:$0]  %s776_s1, 64, %s31_s16, [#allocation7]  }
  0x13   :  { %s583_s5 = scalar_lea.hbm %s775_s0, 1024 }
  0x14   :  { %p584_p8 = scmp.ne.s32.totalorder %s775_s0, %s583_s5  ;;  %p587_p9 = scmp.lt.u32.totalorder %s583_s5, %s775_s0 }
  0x16   :  { %p589_p10 = pnand %p587_p9, %p584_p8 }
  0x18   :  { %592 = shalt.err (!%p589_p10)
}
  0x19   :  { %s593_s10 = scalar_lea.vmem %s686_s18, 1024  ;;  %p598_p12 = scmp.lt.s32.totalorder %s686_s18, %s686_s18 }
  0x1a   :  { %p594_p11 = scmp.ne.s32.totalorder %s686_s18, %s593_s10  ;;  %p599_p13 = scmp.lt.s32.totalorder %s593_s10, %s593_s10 }
  0x1c   :  { %p600_p0 = por %p599_p13, %p598_p12 }
  0x1e   :  { %p601_p1 = pnand %p600_p0, %p594_p11 }
  0x20   :  { %604 = shalt.err (!%p601_p1)
}
  0x21   :  { %s657_s1 = smov 64   ;;  %s658_s11 = smov 4  }
  0x22   :  { %23 = dma.hbm_to_vmem [thread:$0]  %s775_s0, 1024, %s686_s18, [#allocation4], %s657_s1, %s657_s1, %s658_s11  }
  0x23   :  { %s659_s14 = smov [#allocation8]   ;;  %s605_s19 = scalar_lea.hbm %s777_s2, 256 }
  0x24   :  { %s39_s15 = sshll.u32 %s659_s14, 4  ;;  %p606_p2 = scmp.ne.s32.totalorder %s777_s2, %s605_s19  ;;  %s40_s15 = int_to_ptr.vmem [resolvable:$true] %s39_s15 }
  0x25   :  { %p609_p3 = scmp.lt.u32.totalorder %s605_s19, %s777_s2 }
  0x27   :  { %p611_p4 = pnand %p609_p3, %p606_p2 }
  0x29   :  { %614 = shalt.err (!%p611_p4)
}
  0x2a   :  { %s615_s24 = scalar_lea.vmem %s40_s15, 256  ;;  %p620_p6 = scmp.lt.s32.totalorder %s40_s15, %s40_s15 }
  0x2b   :  { %p616_p5 = scmp.ne.s32.totalorder %s40_s15, %s615_s24  ;;  %p621_p7 = scmp.lt.s32.totalorder %s615_s24, %s615_s24 }
  0x2d   :  { %p622_p8 = por %p621_p7, %p620_p6 }
  0x2f   :  { %p623_p9 = pnand %p622_p8, %p616_p5 }
  0x31   :  { %626 = shalt.err (!%p623_p9)
}
  0x32   :  { %45 = dma.hbm_to_vmem [thread:$0]  %s777_s2, 256, %s40_s15, [#allocation7], %s657_s1, %s657_s1, %s658_s11  }
  0x33   :  { %649 = dma.done.wait [#allocation4], 1024  }
  0x34   :  { %650 = vsyncadd [#allocation4], 4294966272 }
  0x35   :  { %651 = dma.done.wait [#allocation7], 320  }
  0x36   :  { %652 = vsyncadd [#allocation7], 4294966976  ;;  %v551_v0 = vld [vmem:[#allocation8] sm:$0xff]   ;;  %v552_v1 = vld [vmem:[#allocation8 + $0x8] sm:$0xff]   ;;  %v254_v2 = vlaneseq  ;;  %vm130_vm0 = vcmask 261120   ;;  %vm454_vm1 = vcmask 1041409  }
  0x37   :  { %521 = vmatprep.subr.bf16.mxu0 %v551_v0  ;;  %541 = vmatprep.subr.bf16.mxu1 %v551_v0  ;;  %v553_v3 = vld [vmem:[#allocation3] sm:$0xff]   ;;  %v555_v5 = vld [vmem:[#allocation3 + $0x8] sm:$0xff]   ;;  %v557_v8 = vld [vmem:[#allocation3 + $0x10] sm:$0xff]   ;;  %vm457_vm2 = vcmask 1042434   ;;  %vm460_vm3 = vcmask 1043459   ;;  %vm463_vm4 = vcmask 1044484  }
  0x38   :  { %522 = vmatpush3.bf16.msra.mxu0 %v551_v0  ;;  %543 = vmatpush3.bf16.msra.mxu1 %v551_v0  ;;  %v554_v4 = vld [vmem:[#allocation3 + $0x20] sm:$0xff]   ;;  %v556_v6 = vld [vmem:[#allocation3 + $0x28] sm:$0xff]   ;;  %v255_v7 = vshrl.u32 %v254_v2, 7  ;;  %v558_v9 = vld [vmem:[#allocation3 + $0x30] sm:$0xff]   ;;  %vm466_vm5 = vcmask 1045509   ;;  %vm469_vm6 = vcmask 1046534  }
  0x39   :  { %523 = vmatprep.subr.bf16.mxu0 %v552_v1  ;;  %542 = vmatprep.subr.bf16.mxu1 %v552_v1  ;;  %v252_v12 = vld [vmem:[#allocation6] sm:$0xf]  ;;  %v559_v16 = vld [vmem:[#allocation3 + $0x18] sm:$0xff]   ;;  %vm472_vm7 = vcmask 1047559  }
  0x3a   :  { %525 = vmatprep.mubr.msk.bf16.mxu0 %vm130_vm0, %v553_v3  ;;  %533 = vmatprep.mubr.msk.bf16.mxu1 %vm130_vm0, %v554_v4  ;;  %v278_v10 = vsub.s32 2, %v255_v7  ;;  %v267_v11 = vsub.s32 1, %v255_v7  ;;  %v253_v13 = vunpack.c.l.bf16 %v252_v12  ;;  %v560_v17 = vld [vmem:[#allocation3 + $0x38] sm:$0xff]   ;;  %v256_v18 = vsub.s32 0, %v255_v7 }
  0x3b   :  { %v289_v20 = vsub.s32 3, %v255_v7  ;;  %v300_v22 = vsub.s32 4, %v255_v7  ;;  %v311_v24 = vsub.s32 5, %v255_v7  ;;  %v322_v26 = vsub.s32 6, %v255_v7 }
  0x3c   :  { %524 = vmatpush3.bf16.msra.mxu0 %v552_v1  ;;  %544 = vmatpush3.bf16.msra.mxu1 %v552_v1  ;;  %v279_v14 = vrot.slane %v253_v13, %v278_v10  ;;  %v268_v15 = vrot.slane %v253_v13, %v267_v11  ;;  %v257_v19 = vrot.slane %v253_v13, %v256_v18  ;;  %v333_v28 = vsub.s32 7, %v255_v7 }
  0x3d   :  { %v290_v21 = vrot.slane %v253_v13, %v289_v20  ;;  %v301_v23 = vrot.slane %v253_v13, %v300_v22  ;;  %v312_v25 = vrot.slane %v253_v13, %v311_v24  ;;  %v323_v27 = vrot.slane %v253_v13, %v322_v26 }
  0x3e   :  { %281 = vbcast.lane.b32.xlu1 %v279_v14, 256  ;;  %270 = vbcast.lane.b32.xlu0 %v268_v15, 256  ;;  %v334_v29 = vrot.slane %v253_v13, %v333_v28 }
  0x3f   :  { %526 = vmatmul.mubr.msk.bf16.vlgmr.msra.gmra.mrb[0].mxu0 %vm130_vm0, %v555_v5  ;;  %534 = vmatmul.mubr.msk.bf16.vlgmr.msra.gmra.mrb[0].mxu1 %vm130_vm0, %v556_v6 }
  0x40   :  { %529 = vmatprep.mubr.msk.bf16.mxu0 %vm130_vm0, %v557_v8  ;;  %537 = vmatprep.mubr.msk.bf16.mxu1 %vm130_vm0, %v558_v9 }
  0x42   :  { %285 = vbcast.lane.b32.xlu1 %v279_v14, 264  ;;  %274 = vbcast.lane.b32.xlu0 %v268_v15, 264 }
  0x46   :  { %263 = vbcast.lane.b32.xlu1 %v257_v19, 264  ;;  %259 = vbcast.lane.b32.xlu0 %v257_v19, 256 }
  0x47   :  { %530 = vmatmul.mubr.msk.bf16.gmra.mrb[4].mxu0 %vm130_vm0, %v559_v16  ;;  %538 = vmatmul.mubr.msk.bf16.gmra.mrb[4].mxu1 %vm130_vm0, %v560_v17 }
  0x4a   :  { %296 = vbcast.lane.b32.xlu1 %v290_v21, 264  ;;  %292 = vbcast.lane.b32.xlu0 %v290_v21, 256 }
  0x4e   :  { %307 = vbcast.lane.b32.xlu1 %v301_v23, 264  ;;  %303 = vbcast.lane.b32.xlu0 %v301_v23, 256 }
  0x52   :  { %318 = vbcast.lane.b32.xlu1 %v312_v25, 264  ;;  %314 = vbcast.lane.b32.xlu0 %v312_v25, 256 }
  0x56   :  { %329 = vbcast.lane.b32.xlu1 %v323_v27, 264  ;;  %325 = vbcast.lane.b32.xlu0 %v323_v27, 256 }
  0x5a   :  { %340 = vbcast.lane.b32.xlu1 %v334_v29, 264  ;;  %336 = vbcast.lane.b32.xlu0 %v334_v29, 256 }
  0xb0   :  { %v737_v30 = vpop.permute.xlu1 %281  ;;  %v271_v31 = vpop.permute.xlu0 %270 }
  0xb4   :  { %v739_v32 = vpop.permute.xlu1 %285  ;;  %v275_v33 = vpop.permute.xlu0 %274 }
  0xb8   :  { %v264_v34 = vpop.permute.xlu1 %263  ;;  %v260_v35 = vpop.permute.xlu0 %259 }
  0xbc   :  { %v297_v36 = vpop.permute.xlu1 %296  ;;  %v293_v37 = vpop.permute.xlu0 %292 }
  0xc0   :  { %v308_v38 = vpop.permute.xlu1 %307  ;;  %v304_v39 = vpop.permute.xlu0 %303 }
  0xc4   :  { %v319_v40 = vpop.permute.xlu1 %318  ;;  %v315_v41 = vpop.permute.xlu0 %314 }
  0xc8   :  { %v330_v42 = vpop.permute.xlu1 %329  ;;  %v326_v43 = vpop.permute.xlu0 %325 }
  0xcc   :  { %v337_v6 = vpop.permute.xlu0 %336  ;;  %v341_v9 = vpop.permute.xlu1 %340 }
 0x112   :  { %v527_v44 = vpop.f32.mrb[0].mxu0  ;;  %v535_v45 = vpop.f32.mrb[0].mxu1 }
 0x113   :  { %v344_v46 = vadd.f32 %v527_v44, %v271_v31  ;;  %v189_v47 = vpop.f32.mrb[1].mxu0  ;;  %v221_v48 = vpop.f32.mrb[1].mxu1  ;;  %v352_v49 = vadd.f32 %v535_v45, %v315_v41 }
 0x114   :  { %v342_v50 = vadd.f32 %v260_v35, %v189_v47  ;;  %v350_v51 = vadd.f32 %v304_v39, %v221_v48  ;;  %v528_v52 = vpop.f32.mrb[2].mxu0  ;;  %v536_v53 = vpop.f32.mrb[2].mxu1 }
 0x115   :  { %v403_v54 = vsel %vm130_vm0, %v352_v49, -inf  ;;  %v345_v55 = vadd.f32 %v528_v52, %v275_v33  ;;  %v353_v56 = vadd.f32 %v536_v53, %v319_v40  ;;  %v192_v57 = vpop.f32.mrb[3].mxu0  ;;  %v224_v58 = vpop.f32.mrb[3].mxu1  ;;  %v367_v62 = vsel %vm130_vm0, %v344_v46, -inf }
 0x116   :  { %v394_v59 = vsel %vm130_vm0, %v350_v51, -inf  ;;  %v343_v60 = vadd.f32 %v264_v34, %v192_v57  ;;  %v351_v61 = vadd.f32 %v308_v38, %v224_v58  ;;  %v358_v63 = vsel %vm130_vm0, %v342_v50, -inf }
 0x117   :  { %v368_v0 = vsel %vm130_vm0, %v345_v55, -inf  ;;  %v404_v1 = vsel %vm130_vm0, %v353_v56, -inf }
 0x118   :  { %v369_v2 = vmax.f32 %v367_v62, %v368_v0  ;;  %v405_v3 = vmax.f32 %v403_v54, %v404_v1  ;;  %v359_v4 = vsel %vm130_vm0, %v343_v60, -inf  ;;  %v395_v5 = vsel %vm130_vm0, %v351_v61, -inf }
 0x119   :  { %v360_v7 = vmax.f32 %v358_v63, %v359_v4  ;;  %v396_v8 = vmax.f32 %v394_v59, %v395_v5 }
 0x11a   :  { %v370_v10 = vrot.slane %v369_v2, 4  ;;  %v406_v11 = vrot.slane %v405_v3, 4  ;;  %v531_v12 = vpop.f32.mrb[4].mxu0  ;;  %v539_v13 = vpop.f32.mrb[4].mxu1 }
 0x11b   :  { %v361_v14 = vrot.slane %v360_v7, 4  ;;  %v397_v15 = vrot.slane %v396_v8, 4  ;;  %v205_v16 = vpop.f32.mrb[5].mxu0  ;;  %v237_v17 = vpop.f32.mrb[5].mxu1  ;;  %v356_v18 = vadd.f32 %v539_v13, %v337_v6  ;;  %v348_v20 = vadd.f32 %v531_v12, %v293_v37 }
 0x11c   :  { %v371_v19 = vmax.f32 %v369_v2, %v370_v10  ;;  %v532_v21 = vpop.f32.mrb[6].mxu0  ;;  %v540_v22 = vpop.f32.mrb[6].mxu1  ;;  %v407_v23 = vmax.f32 %v405_v3, %v406_v11  ;;  %v346_v29 = vadd.f32 %v737_v30, %v205_v16  ;;  %v354_v31 = vadd.f32 %v326_v43, %v237_v17 }
 0x11d   :  { %v362_v24 = vmax.f32 %v360_v7, %v361_v14  ;;  %v208_v25 = vpop.f32.mrb[7].mxu0  ;;  %v240_v26 = vpop.f32.mrb[7].mxu1  ;;  %v398_v28 = vmax.f32 %v396_v8, %v397_v15  ;;  %v421_v34 = vsel %vm130_vm0, %v356_v18, -inf  ;;  %v349_v35 = vadd.f32 %v532_v21, %v297_v36  ;;  %v510_v36 = vld [vmem:[%s778_s3] ss:$0 sm:$0xff]  ;;  %s660_s3 = smov [#allocation9]  }
 0x11e   :  { %v372_v27 = vrot.slane %v371_v19, 2  ;;  %v357_v38 = vadd.f32 %v540_v22, %v341_v9  ;;  %v385_v40 = vsel %vm130_vm0, %v348_v20, -inf  ;;  %v347_v37 = vadd.f32 %v739_v32, %v208_v25  ;;  %s482_s26 = sshll.u32 %s660_s3, 4  ;;  %s483_s26 = int_to_ptr.vmem [resolvable:$true] %s482_s26 }
 0x11f   :  { %v363_v33 = vrot.slane %v362_v24, 2  ;;  %v355_v41 = vadd.f32 %v330_v42, %v240_v26  ;;  %v408_v44 = vrot.slane %v407_v23, 2  ;;  %v386_v46 = vsel %vm130_vm0, %v349_v35, -inf  ;;  %s627_s27 = scalar_lea.vmem %s483_s26, 128  ;;  %p632_p11 = scmp.lt.s32.totalorder %s483_s26, %s483_s26 }
 0x120   :  { %v373_v39 = vmax.f32 %v371_v19, %v372_v27  ;;  %v422_v47 = vsel %vm130_vm0, %v357_v38, -inf  ;;  %v412_v30 = vsel %vm130_vm0, %v354_v31, -inf  ;;  %v387_v43 = vmax.f32 %v385_v40, %v386_v46  ;;  %p628_p10 = scmp.ne.s32.totalorder %s483_s26, %s627_s27  ;;  %p633_p12 = scmp.lt.s32.totalorder %s627_s27, %s627_s27 }
 0x121   :  { %v364_v45 = vmax.f32 %v362_v24, %v363_v33  ;;  %v423_v49 = vmax.f32 %v421_v34, %v422_v47  ;;  %v399_v51 = vrot.slane %v398_v28, 2  ;;  %v377_v32 = vsel %vm130_vm0, %v347_v37, -inf }
 0x122   :  { %v374_v48 = vrot.slane %v373_v39, 1  ;;  %v413_v42 = vsel %vm130_vm0, %v355_v41, -inf  ;;  %v376_v53 = vsel %vm130_vm0, %v346_v29, -inf  ;;  %v388_v54 = vrot.slane %v387_v43, 4  ;;  %p634_p13 = por %p633_p12, %p632_p11 }
 0x123   :  { %v365_v50 = vrot.slane %v364_v45, 1  ;;  %v424_v55 = vrot.slane %v423_v49, 4  ;;  %v378_v57 = vmax.f32 %v376_v53, %v377_v32  ;;  %v414_v58 = vmax.f32 %v412_v30, %v413_v42 }
 0x124   :  { %v375_v52 = vmax.f32 %v373_v39, %v374_v48  ;;  %v389_v60 = vmax.f32 %v387_v43, %v388_v54  ;;  %v400_v63 = vmax.f32 %v398_v28, %v399_v51  ;;  %v409_v3 = vmax.f32 %v407_v23, %v408_v44  ;;  %p635_p0 = pnand %p634_p13, %p628_p10 }
 0x125   :  { %v366_v56 = vmax.f32 %v364_v45, %v365_v50  ;;  %v425_v61 = vmax.f32 %v423_v49, %v424_v55  ;;  %v379_v0 = vrot.slane %v378_v57, 4  ;;  %v415_v1 = vrot.slane %v414_v58, 4 }
 0x126   :  { %v438_v59 = vadd.f32 %v510_v36, %v375_v52  ;;  %v390_v4 = vrot.slane %v389_v60, 2  ;;  %v401_v11 = vrot.slane %v400_v63, 1  ;;  %v410_v14 = vrot.slane %v409_v3, 1 }
 0x127   :  { %v437_v62 = vadd.f32 %v510_v36, %v366_v56  ;;  %v426_v5 = vrot.slane %v425_v61, 2  ;;  %v380_v6 = vmax.f32 %v378_v57, %v379_v0  ;;  %v416_v7 = vmax.f32 %v414_v58, %v415_v1 }
 0x128   :  { %v453_v2 = vrot.slane %v438_v59, 7  ;;  %v391_v9 = vmax.f32 %v389_v60, %v390_v4  ;;  %v402_v20 = vmax.f32 %v400_v63, %v401_v11  ;;  %v411_v23 = vmax.f32 %v409_v3, %v410_v14 }
 0x129   :  { %v427_v10 = vmax.f32 %v425_v61, %v426_v5  ;;  %v381_v12 = vrot.slane %v380_v6, 2  ;;  %v417_v13 = vrot.slane %v416_v7, 2 }
 0x12a   :  { %v455_v8 = vsel %vm454_vm1, %v453_v2, %v437_v62  ;;  %v392_v15 = vrot.slane %v391_v9, 1  ;;  %v441_v28 = vadd.f32 %v510_v36, %v402_v20  ;;  %v442_v31 = vadd.f32 %v510_v36, %v411_v23 }
 0x12b   :  { %v382_v16 = vmax.f32 %v380_v6, %v381_v12  ;;  %v418_v17 = vmax.f32 %v416_v7, %v417_v13  ;;  %v428_v19 = vrot.slane %v427_v10, 1 }
 0x12c   :  { %v393_v18 = vmax.f32 %v391_v9, %v392_v15  ;;  %v462_v39 = vrot.slane %v441_v28, 4  ;;  %v465_v37 = vrot.slane %v442_v31, 3 }
 0x12d   :  { %v383_v21 = vrot.slane %v382_v16, 1  ;;  %v419_v22 = vrot.slane %v418_v17, 1  ;;  %v429_v27 = vmax.f32 %v427_v10, %v428_v19 }
 0x12e   :  { %v440_v26 = vadd.f32 %v510_v36, %v393_v18 }
 0x12f   :  { %v384_v24 = vmax.f32 %v382_v16, %v383_v21  ;;  %v420_v25 = vmax.f32 %v418_v17, %v419_v22  ;;  %v444_v38 = vadd.f32 %v510_v36, %v429_v27 }
 0x130   :  { %v459_v35 = vrot.slane %v440_v26, 5 }
 0x131   :  { %v439_v29 = vadd.f32 %v510_v36, %v384_v24  ;;  %v443_v34 = vadd.f32 %v510_v36, %v420_v25  ;;  %v471_v47 = vrot.slane %v444_v38, 1 }
 0x133   :  { %v456_v33 = vrot.slane %v439_v29, 6  ;;  %v468_v45 = vrot.slane %v443_v34, 2 }
 0x135   :  { %v458_v40 = vsel %vm457_vm2, %v456_v33, %v455_v8 }
 0x136   :  { %v461_v41 = vsel %vm460_vm3, %v459_v35, %v458_v40 }
 0x137   :  { %v464_v44 = vsel %vm463_vm4, %v462_v39, %v461_v41 }
 0x138   :  { %v467_v46 = vsel %vm466_vm5, %v465_v37, %v464_v44 }
 0x139   :  { %v470_v48 = vsel %vm469_vm6, %v468_v45, %v467_v46 }
 0x13a   :  { %v473_v30 = vsel %vm472_vm7, %v471_v47, %v470_v48 }
 0x13b   :  { %475 = vst.msk [vmem:[#allocation9] sm:$0xff] %vm130_vm0, %v473_v30 }
 0x13c   :  { %638 = shalt.err (!%p635_p0)
}
 0x13d   :  { %s639_s30 = scalar_lea.hbm %s779_s4, 128 }
 0x13e   :  { %p640_p1 = scmp.ne.s32.totalorder %s779_s4, %s639_s30  ;;  %p643_p2 = scmp.lt.u32.totalorder %s639_s30, %s779_s4 }
 0x140   :  { %p645_p3 = pnand %p643_p2, %p640_p1 }
 0x142   :  { %648 = shalt.err (!%p645_p3)
}
 0x143   :  { %485 = dma.vmem_to_hbm [thread:$0]  %s483_s26, 128, %s779_s4, [#allocation5]  }
 0x144   :  { %653 = dma.done.wait [#allocation5], 128  }
 0x145   :  { %654 = vsyncadd [#allocation5], 4294967168 }
 0x146   :  { %489 = vsyncpa [#allocation4], 1 }
 0x147   :  { %490 = vsyncpa [#allocation7], 1 }
 0x148   :  { %491 = vsyncpa [#allocation5], 1 }

</bundles_post_ra>
